<compile_context>
chip_gen: v7x
topology: tpu7x:2x2x1
jax: 0.10.0
libtpu: 0.0.40
codegen_flags: <defaults>
</compile_context>

<pallas_src>
import functools

import jax
import jax.numpy as jnp
from jax.experimental import pallas as pl
from jax.experimental.pallas import tpu as pltpu


def _round_up(x, m):
    return ((x + m - 1) // m) * m


def _checkin_embed_kernel(gidx_ref, wtab_ref, o_ref, *, n_feat, precision):
    """gidx_ref: (tile_s, n_feat) int32 global (offset) indices.
    wtab_ref: (sum_V, n_feat*E) block-diagonal weight.
    o_ref:    (tile_s, n_feat*E) output slab."""
    gidx = gidx_ref[...]                                   # (tile_s, n_feat)
    tile_s = gidx.shape[0]
    v_total = wtab_ref.shape[0]

    # Single one-hot over the stacked vocab: each feature hits a disjoint row
    # range, so OR-ing the per-feature matches gives exactly n_feat ones per
    # row (or fewer if an index is out of range -> that feature reads zeros).
    iota = jax.lax.broadcasted_iota(jnp.int32, (tile_s, v_total), 1)
    hit = iota == gidx[:, 0:1]
    for f in range(1, n_feat):
        hit = jnp.logical_or(hit, iota == gidx[:, f:f + 1])
    onehot = hit.astype(wtab_ref.dtype)

    # One MXU matmul produces the already-concatenated, lane-contiguous slab.
    o_ref[...] = jnp.dot(
        onehot, wtab_ref[...],
        preferred_element_type=jnp.float32,
        precision=precision,
    ).astype(o_ref.dtype)


def build_block_diag_table(tables):
    """Stack per-feature tables into one block-diagonal (sum_V, n_feat*E)
    weight.  In a real model this is done once at parameter-load time."""
    n_feat = len(tables)
    e = tables[0].shape[1]
    dtype = tables[0].dtype
    offsets, off = [], 0
    for t in tables:
        offsets.append(off)
        off += t.shape[0]
    v_total = off
    w = jnp.zeros((v_total, n_feat * e), dtype=dtype)
    for f, t in enumerate(tables):
        w = w.at[offsets[f]:offsets[f] + t.shape[0],
                 f * e:(f + 1) * e].set(t.astype(dtype))
    return w, jnp.asarray(offsets, jnp.int32), v_total


def check_in_embedding(x, tables, *, tile_s=None):
    """x: (5, S) integer indices; tables: list of 5 arrays, each (V_f + 1, E).

    Returns (S, 5*E), matching torch.cat of the five embedding lookups."""
    n_feat = len(tables)
    assert x.shape[0] == n_feat
    s = x.shape[1]
    e = tables[0].shape[1]
    out_dim = n_feat * e
    wdtype = tables[0].dtype

    w, offsets, v_total = build_block_diag_table(tables)

    # Global indices into the stacked vocab (lane-minor feature axis).
    gidx = jnp.asarray(x, jnp.int32).T + offsets[None, :]     # (S, n_feat)

    # Sequence tiling: aim for >= 2 grid steps when S allows (v7x megacore),
    # cap at 1024 rows/tile (write-bound; per-step overhead ~0.35 us).
    if tile_s is None:
        if s <= 16:
            tile_s = _round_up(max(s, 8), 8)
        else:
            tile_s = min(1024, _round_up(pl.cdiv(s, 2), 8))
    tile_s = max(8, _round_up(tile_s, 8))
    grid_n = pl.cdiv(s, tile_s)
    s_pad = grid_n * tile_s
    if s_pad != s:
        # Pad with an out-of-range index -> zero rows, sliced off below.
        gidx = jnp.pad(gidx, ((0, s_pad - s), (0, 0)), constant_values=v_total)

    # f32 tables: exact multi-pass MXU accumulation (bit-faithful lookup).
    # bf16 tables: 0/1 one-hot in bf16 is exact on the single-pass bf16 MXU.
    precision = (jax.lax.Precision.HIGHEST
                 if wdtype == jnp.float32 else jax.lax.Precision.DEFAULT)

    kernel = functools.partial(_checkin_embed_kernel,
                               n_feat=n_feat, precision=precision)

    # Explicit VMEM budget: table (double-buffered constant block) + index /
    # output tiles (double-buffered) + one-hot live value, with 2x slack.
    itemsize = jnp.dtype(wdtype).itemsize
    vmem_bytes = (2 * v_total * out_dim * itemsize
                  + 2 * tile_s * (_round_up(n_feat, 8) * 4 + out_dim * itemsize)
                  + tile_s * _round_up(v_total, 128) * 4)
    vmem_limit = int(min(max(2 * vmem_bytes, 32 * 1024 * 1024),
                         64 * 1024 * 1024))

    out = pl.pallas_call(
        kernel,
        out_shape=jax.ShapeDtypeStruct((s_pad, out_dim), wdtype),
        grid=(grid_n,),
        in_specs=[
            pl.BlockSpec((tile_s, n_feat), lambda i: (i, 0)),
            # Whole block-diagonal table, constant block across grid steps
            # (VMEM-resident, never re-DMA'd).
            pl.BlockSpec((v_total, out_dim), lambda i: (0, 0)),
        ],
        out_specs=pl.BlockSpec((tile_s, out_dim), lambda i: (i, 0)),
        compiler_params=pltpu.CompilerParams(
            dimension_semantics=("parallel",),
            vmem_limit_bytes=vmem_limit),
    )(gidx, w)
    return out[:s] if s_pad != s else out


if __name__ == "__main__":
    embed_size = 32
    vocab_size = {"POI": 100, "cat": 20, "user": 10, "hour": 24, "day": 7}
    seq_len = 8
    names = ["POI", "cat", "user", "hour", "day"]

    key0 = jax.random.PRNGKey(0)
    keys = jax.random.split(key0, 6)

    # Embedding tables: (vocab+1, E) with the padding row (index = vocab)
    # zeroed, matching nn.Embedding(vocab+1, E, padding_idx=vocab) forward.
    tables = []
    for k, name in zip(keys[:5], names):
        n = vocab_size[name]
        wt = jax.random.normal(k, (n + 1, embed_size), dtype=jnp.float32)
        wt = wt.at[n].set(0.0)
        tables.append(wt)

    # Indices x: (5, seq), each row f drawn from [0, vocab_f] (padding allowed).
    idx_keys = jax.random.split(keys[5], 5)
    idx_rows = []
    for name, k in zip(names, idx_keys):
        n = vocab_size[name]
        idx_rows.append(
            jax.random.randint(k, (seq_len,), 0, n + 1, dtype=jnp.int32))
    x = jnp.stack(idx_rows, axis=0)                      # (5, seq)
    x = x.at[0, -1].set(vocab_size["POI"])               # force a padded POI slot

    out = check_in_embedding(x, tables)
    out = jax.block_until_ready(out)

    # Pure-JAX reference of the PyTorch semantics.
    ref = jnp.concatenate(
        [jnp.take(t, x[f], axis=0) for f, t in enumerate(tables)], axis=1)

    assert out.shape == (seq_len, 5 * embed_size)
    assert jnp.allclose(out, ref, atol=1e-5, rtol=1e-5), "mismatch vs reference"
    # Padding row must be exactly zero.
    assert jnp.all(out[-1, :embed_size] == 0.0), "padding_idx row not zero"
    print("KERNEL_OK")
</pallas_src>

<mosaic_0001>
module attributes {stable_mosaic.version = 11 : i64} {
  func.func @_checkin_embed_kernel(%arg0: i32, %arg1: memref<8x5xi32, #tpu.memory_space<vmem>>, %arg2: memref<166x160xf32, #tpu.memory_space<vmem>>, %arg3: memref<8x160xf32, #tpu.memory_space<vmem>>) attributes {dimension_semantics = [#tpu.dimension_semantics<parallel>], iteration_bounds = array<i64: 1>, scalar_prefetch = 0 : i64, scratch_operands = 0 : i64, tpu.core_type = #tpu.core_type<tc>, window_params = [{transform_indices = @transform_0, window_bounds = array<i64: 8, 5>}, {pipeline_mode = #tpu.pipeline_mode<synchronous>, transform_indices = @transform_1, window_bounds = array<i64: 166, 160>}, {transform_indices = @transform_2, window_bounds = array<i64: 8, 160>}]} {
    %c0 = arith.constant 0 : index
    %c0_0 = arith.constant 0 : index
    %0 = vector.load %arg1[%c0, %c0_0] : memref<8x5xi32, #tpu.memory_space<vmem>>, vector<8x5xi32>
    %1 = tpu.iota {dimensions = array<i32: 1>} : vector<8x166xi32>
    %2 = vector.extract_strided_slice %0 {offsets = [0, 0], sizes = [8, 1], strides = [1, 1]} : vector<8x5xi32> to vector<8x1xi32>
    %3 = vector.broadcast %2 : vector<8x1xi32> to vector<8x166xi32>
    %4 = arith.cmpi eq, %1, %3 : vector<8x166xi32>
    %5 = vector.extract_strided_slice %0 {offsets = [0, 1], sizes = [8, 1], strides = [1, 1]} : vector<8x5xi32> to vector<8x1xi32>
    %6 = vector.broadcast %5 : vector<8x1xi32> to vector<8x166xi32>
    %7 = arith.cmpi eq, %1, %6 : vector<8x166xi32>
    %8 = arith.ori %4, %7 : vector<8x166xi1>
    %9 = vector.extract_strided_slice %0 {offsets = [0, 2], sizes = [8, 1], strides = [1, 1]} : vector<8x5xi32> to vector<8x1xi32>
    %10 = vector.broadcast %9 : vector<8x1xi32> to vector<8x166xi32>
    %11 = arith.cmpi eq, %1, %10 : vector<8x166xi32>
    %12 = arith.ori %8, %11 : vector<8x166xi1>
    %13 = vector.extract_strided_slice %0 {offsets = [0, 3], sizes = [8, 1], strides = [1, 1]} : vector<8x5xi32> to vector<8x1xi32>
    %14 = vector.broadcast %13 : vector<8x1xi32> to vector<8x166xi32>
    %15 = arith.cmpi eq, %1, %14 : vector<8x166xi32>
    %16 = arith.ori %12, %15 : vector<8x166xi1>
    %17 = vector.extract_strided_slice %0 {offsets = [0, 4], sizes = [8, 1], strides = [1, 1]} : vector<8x5xi32> to vector<8x1xi32>
    %18 = vector.broadcast %17 : vector<8x1xi32> to vector<8x166xi32>
    %19 = arith.cmpi eq, %1, %18 : vector<8x166xi32>
    %20 = arith.ori %16, %19 : vector<8x166xi1>
    %21 = arith.extui %20 : vector<8x166xi1> to vector<8x166xi32>
    %22 = arith.sitofp %21 : vector<8x166xi32> to vector<8x166xf32>
    %c0_1 = arith.constant 0 : index
    %c0_2 = arith.constant 0 : index
    %23 = vector.load %arg2[%c0_1, %c0_2] : memref<166x160xf32, #tpu.memory_space<vmem>>, vector<166x160xf32>
    %cst = arith.constant dense<0.000000e+00> : vector<8x160xf32>
    %24 = tpu.matmul %22, %23, %cst {dimension_numbers = #tpu.dot_dimension_numbers<[1], [0], [0], [1], [0, 0, 1, 1], [], []>, precision = #tpu.contract_precision<fp32>} : vector<8x166xf32>, vector<166x160xf32>, vector<8x160xf32> -> vector<8x160xf32>
    %c0_3 = arith.constant 0 : index
    %c0_4 = arith.constant 0 : index
    %25 = vector.load %arg3[%c0_3, %c0_4] : memref<8x160xf32, #tpu.memory_space<vmem>>, vector<8x160xf32>
    tpu.vector_store %arg3[%c0_3, %c0_4], %24 {strides = array<i32>} : memref<8x160xf32, #tpu.memory_space<vmem>>, vector<8x160xf32>,
    return
  }
  func.func @transform_0(%arg0: i32) -> (i32, i32) {
    %c0_i32 = arith.constant 0 : i32
    %c0_i32_0 = arith.constant 0 : i32
    return %arg0, %c0_i32 : i32, i32
  }
  func.func @transform_1(%arg0: i32) -> (i32, i32) {
    %c0_i32 = arith.constant 0 : i32
    %c0_i32_0 = arith.constant 0 : i32
    %c0_i32_1 = arith.constant 0 : i32
    return %c0_i32, %c0_i32_0 : i32, i32
  }
  func.func @transform_2(%arg0: i32) -> (i32, i32) {
    %c0_i32 = arith.constant 0 : i32
    %c0_i32_0 = arith.constant 0 : i32
    return %arg0, %c0_i32 : i32, i32
  }
}

</mosaic_0001>

<bundles_post_ra>
// kernel: tpu_custom_call.1
= control target key start
LH: loop header
LB: loop body
LE: loop exit
PB: predicated region body
PF: predicated region fallthrough
CT: control target
= control target key end

     0   :  { %v1413_v2 = vmov 2   ;;  %v1414_v3 = vmov 0   ;;  %v1415_v31 = vmov 3   ;;  %v1416_v32 = vmov 1   ;;  %s2152_s0 = inlined_call_operand.vmem [shape: s32[8,5], index: 0, kind: input, shape index: {}]   ;;  %s2153_s1 = inlined_call_operand.vmem [shape: f32[166,160], index: 1, kind: input, shape index: {}]   ;;  %s2154_s2 = inlined_call_operand.hbm [shape: f32[8,160], index: 2, kind: output, shape index: {}]  }
   0x1   :  { %v1438_v0 = vld [vmem:[%s2152_s0] sm:$0xff]  ;;  %v1443_v1 = vld [vmem:[%s2153_s1 + $0x8] sm:$0xff]  ;;  %1385 = vset.pattern.permute.xlu1 %v1413_v2  ;;  %1383 = vset.pattern.permute.xlu0 %v1414_v3  ;;  %v1448_v4 = vld [vmem:[%s2153_s1 + $0x18] sm:$0xff]  ;;  %v1417_v59 = vmov 4  }
   0x2   :  { %v106_v5 = vand.u32 4294901760, %v1443_v1  ;;  %v53_v6 = vld [vmem:[%s2153_s1] sm:$0xff]  ;;  %v55_v7 = vld [vmem:[%s2153_s1 + $0x10] sm:$0xff]  ;;  %29 = vperm.xlu1 %1385, %v1438_v0   ;;  %17 = vperm.xlu0 %1383, %v1438_v0   ;;  %v110_v8 = vand.u32 4294901760, %v1448_v4  ;;  %v58_v11 = vld [vmem:[%s2153_s1 + $0x28] sm:$0xff] }
   0x3   :  { %v108_v9 = vand.u32 4294901760, %v53_v6  ;;  %v112_v10 = vand.u32 4294901760, %v55_v7  ;;  %v60_v12 = vld [vmem:[%s2153_s1 + $0x38] sm:$0xff]  ;;  %v57_v13 = vld [vmem:[%s2153_s1 + $0x20] sm:$0xff]  ;;  %v114_v14 = vand.u32 4294901760, %v58_v11  ;;  %v59_v16 = vld [vmem:[%s2153_s1 + $0x30] sm:$0xff] }
   0x4   :  { %v118_v15 = vand.u32 4294901760, %v60_v12  ;;  %v62_v17 = vld [vmem:[%s2153_s1 + $0x48] sm:$0xff]  ;;  %v64_v18 = vld [vmem:[%s2153_s1 + $0x58] sm:$0xff]  ;;  %v1482_v19 = vpack.c.bf16 %v110_v8, %v106_v5  ;;  %v116_v22 = vand.u32 4294901760, %v57_v13  ;;  %v61_v23 = vld [vmem:[%s2153_s1 + $0x40] sm:$0xff]  ;;  %v120_v33 = vand.u32 4294901760, %v59_v16 }
   0x5   :  { %v1484_v20 = vpack.c.bf16 %v112_v10, %v108_v9  ;;  %v1486_v21 = vsub.f32 %v53_v6, %v108_v9  ;;  %v63_v24 = vld [vmem:[%s2153_s1 + $0x50] sm:$0xff]  ;;  %v1494_v25 = vsub.f32 %v55_v7, %v112_v10  ;;  %v1498_v27 = vsub.f32 %v58_v11, %v114_v14  ;;  %v66_v29 = vld [vmem:[%s2153_s1 + $0x68] sm:$0xff]  ;;  %v68_v30 = vld [vmem:[%s2153_s1 + $0x78] sm:$0xff] }
   0x6   :  { %2188 = vst [vmem:[#allocation5_spill] sm:$0xff] %v1482_v19  ;;  %v1496_v26 = vpack.c.bf16 %v118_v15, %v114_v14  ;;  %v1500_v28 = vsub.f32 %v60_v12, %v118_v15  ;;  %1386 = vset.pattern.permute.xlu1 %v1415_v31  ;;  %1384 = vset.pattern.permute.xlu0 %v1416_v32  ;;  %v122_v35 = vand.u32 4294901760, %v62_v17  ;;  %v126_v36 = vand.u32 4294901760, %v64_v18  ;;  %v1513_v37 = vld [vmem:[%s2153_s1 + $0x60] sm:$0xff]  ;;  %v1520_v40 = vld [vmem:[%s2153_s1 + $0x70] sm:$0xff]  ;;  %v1525_v41 = vld [vmem:[%s2153_s1 + $0x88] sm:$0xff] }
   0x7   :  { %2189 = vst [vmem:[#allocation6_spill] sm:$0xff] %v1484_v20  ;;  %2190 = vst [vmem:[#allocation7_spill] sm:$0xff] %v1486_v21  ;;  %v1508_v34 = vsub.f32 %v57_v13, %v116_v22  ;;  %36 = vperm.xlu1 %1386, %v1438_v0   ;;  %22 = vperm.xlu0 %1384, %v1438_v0   ;;  %v124_v38 = vand.u32 4294901760, %v61_v23  ;;  %v128_v39 = vand.u32 4294901760, %v63_v24  ;;  %v130_v44 = vand.u32 4294901760, %v66_v29  ;;  %v72_v50 = vld [vmem:[%s2153_s1 + $0x98] sm:$0xff] }
   0x8   :  { %2191 = vst [vmem:[#allocation8_spill] sm:$0xff] %v1494_v25  ;;  %2192 = vst [vmem:[#allocation9_spill] sm:$0xff] %v1496_v26  ;;  %1247 = vmatprep.subr.bf16.mxu0 %v1482_v19  ;;  %1127 = vmatprep.subr.bf16.mxu1 %v1482_v19  ;;  %v1529_v42 = vpack.c.bf16 %v120_v33, %v116_v22  ;;  %v1531_v43 = vsub.f32 %v59_v16, %v120_v33  ;;  %v134_v45 = vand.u32 4294901760, %v68_v30  ;;  %v69_v51 = vld [vmem:[%s2153_s1 + $0x80] sm:$0xff]  ;;  %v71_v56 = vld [vmem:[%s2153_s1 + $0x90] sm:$0xff] }
   0x9   :  { %2193 = vst [vmem:[#allocation10_spill] sm:$0xff] %v1498_v27  ;;  %1249 = vmatpush1.bf16.msra.mxu0 %v1484_v20  ;;  %1129 = vmatpush1.bf16.msra.mxu1 %v1484_v20  ;;  %v1535_v46 = vpack.c.bf16 %v126_v36, %v122_v35  ;;  %v1537_v47 = vsub.f32 %v62_v17, %v122_v35  ;;  %v132_v49 = vand.u32 4294901760, %v1513_v37  ;;  %v136_v54 = vand.u32 4294901760, %v1520_v40  ;;  %v1562_v57 = vld [vmem:[%s2153_s1 + $0xa8] sm:$0xff]  ;;  %v76_v58 = vld [vmem:[%s2153_s1 + $0xb8] sm:$0xff]  ;;  %v73_v2 = vld [vmem:[%s2153_s1 + $0xa0] sm:$0xff] }
   0xa   :  { %2194 = vst [vmem:[#allocation11_spill] sm:$0xff] %v1529_v42  ;;  %v1539_v48 = vsub.f32 %v64_v18, %v126_v36  ;;  %1251 = vmatprep.subr.bf16.mxu0 %v1496_v26  ;;  %1131 = vmatprep.subr.bf16.mxu1 %v1496_v26  ;;  %v1550_v52 = vsub.f32 %v61_v23, %v124_v38  ;;  %v138_v55 = vand.u32 4294901760, %v1525_v41  ;;  %v75_v3 = vld [vmem:[%s2153_s1 + $0xb0] sm:$0xff]  ;;  %v142_v7 = vand.u32 4294901760, %v72_v50  ;;  %v78_v18 = vld [vmem:[%s2153_s1 + $0xc8] sm:$0xff]  ;;  %v80_v22 = vld [vmem:[%s2153_s1 + $0xd8] sm:$0xff] }
   0xb   :  { %2195 = vst [vmem:[#allocation12_spill] sm:$0xff] %v1535_v46  ;;  %v1552_v53 = vsub.f32 %v63_v24, %v128_v39  ;;  %1387 = vset.pattern.permute.xlu1 %v1417_v59  ;;  %v1567_v60 = vpack.c.bf16 %v128_v39, %v124_v38  ;;  %v1569_v61 = vsub.f32 %v66_v29, %v130_v44  ;;  %v140_v10 = vand.u32 4294901760, %v69_v51 }
   0xc   :  { %v1571_v62 = vsub.f32 %v68_v30, %v134_v45  ;;  %v1574_v63 = vsub.f32 %v1513_v37, %v132_v49  ;;  %43 = vperm.xlu1 %1387, %v1438_v0   ;;  %v1584_v6 = vsub.f32 %v1520_v40, %v136_v54  ;;  %v1587_v9 = vsub.f32 %v1525_v41, %v138_v55 }
   0xd   :  { %2196 = vst [vmem:[#allocation13_spill] sm:$0xff] %v1567_v60  ;;  %1388 = vset.pattern.permute.xlu0 %v1417_v59  ;;  %1253 = vmatpush1.bf16.msra.mxu0 %v1529_v42  ;;  %v1591_v11 = vpack.c.bf16 %v134_v45, %v130_v44  ;;  %v144_v12 = vand.u32 4294901760, %v71_v56  ;;  %v146_v13 = vand.u32 4294901760, %v1562_v57  ;;  %v150_v14 = vand.u32 4294901760, %v76_v58 }
   0xe   :  { %1133 = vmatpush1.bf16.msra.mxu1 %v1529_v42  ;;  %1255 = vmatprep.subr.bf16.mxu0 %v1535_v46  ;;  %v1596_v0 = vsub.f32 %v72_v50, %v142_v7  ;;  %v1598_v15 = vsub.f32 %v69_v51, %v140_v10  ;;  %v148_v16 = vand.u32 4294901760, %v73_v2  ;;  %v152_v17 = vand.u32 4294901760, %v75_v3 }
   0xf   :  { %2197 = vst [vmem:[#allocation14_spill] sm:$0xff] %v1591_v11  ;;  %1135 = vmatprep.subr.bf16.mxu1 %v1535_v46 }
  0x10   :  { %7 = vsyncpa [#allocation3], 0  ;;  %v1609_v23 = vsub.f32 %v1443_v1, %v106_v5  ;;  %v1611_v24 = vsub.f32 %v71_v56, %v144_v12  ;;  %v1614_v29 = vsub.f32 %v1562_v57, %v146_v13  ;;  %v77_v30 = vld [vmem:[%s2153_s1 + $0xc0] sm:$0xff]  ;;  %v79_v31 = vld [vmem:[%s2153_s1 + $0xd0] sm:$0xff]  ;;  %v1628_v1 = vsub.f32 %v1448_v4, %v110_v8 }
  0x11   :  { %v82_v32 = vld [vmem:[%s2153_s1 + $0xe8] sm:$0xff]  ;;  %v1630_v5 = vsub.f32 %v76_v58, %v150_v14  ;;  %v1632_v33 = vsub.f32 %v73_v2, %v148_v16  ;;  %v1634_v35 = vsub.f32 %v75_v3, %v152_v17  ;;  %v84_v36 = vld [vmem:[%s2153_s1 + $0xf8] sm:$0xff]  ;;  %v81_v37 = vld [vmem:[%s2153_s1 + $0xe0] sm:$0xff]  ;;  %1257 = vmatpush1.bf16.msra.mxu0 %v1567_v60  ;;  %v1644_v4 = vpack.c.bf16 %v136_v54, %v132_v49 }
  0x12   :  { %1137 = vmatpush1.bf16.msra.mxu1 %v1567_v60  ;;  %v1646_v8 = vpack.c.bf16 %v142_v7, %v138_v55  ;;  %v154_v38 = vand.u32 4294901760, %v78_v18  ;;  %v158_v39 = vand.u32 4294901760, %v80_v22  ;;  %1259 = vmatprep.subr.bf16.mxu0 %v1591_v11  ;;  %v1650_v40 = vpack.c.bf16 %v144_v12, %v140_v10  ;;  %v83_v50 = vld [vmem:[%s2153_s1 + $0xf0] sm:$0xff]  ;;  %v86_v56 = vld [vmem:[%s2153_s1 + $0x108] sm:$0xff]  ;;  %v88_v57 = vld [vmem:[%s2153_s1 + $0x118] sm:$0xff] }
  0x13   :  { %2198 = vst [vmem:[#allocation15_spill] sm:$0xff] %v1644_v4  ;;  %1139 = vmatprep.subr.bf16.mxu1 %v1591_v11  ;;  %v156_v41 = vand.u32 4294901760, %v77_v30  ;;  %v160_v44 = vand.u32 4294901760, %v79_v31  ;;  %v162_v45 = vand.u32 4294901760, %v82_v32  ;;  %v166_v54 = vand.u32 4294901760, %v84_v36  ;;  %v85_v7 = vld [vmem:[%s2153_s1 + $0x100] sm:$0xff] }
  0x14   :  { %2199 = vst [vmem:[#allocation16_spill] sm:$0xff] %v1646_v8  ;;  %2200 = vst [vmem:[#allocation17_spill] sm:$0xff] %v1650_v40  ;;  %v1655_v51 = vsub.f32 %v78_v18, %v154_v38  ;;  %v1657_v49 = vsub.f32 %v80_v22, %v158_v39  ;;  %v164_v55 = vand.u32 4294901760, %v81_v37  ;;  %v1665_v58 = vpack.c.bf16 %v150_v14, %v146_v13  ;;  %v87_v10 = vld [vmem:[%s2153_s1 + $0x110] sm:$0xff]  ;;  %v90_v12 = vld [vmem:[%s2153_s1 + $0x128] sm:$0xff] }
  0x15   :  { %v1667_v59 = vpack.c.bf16 %v152_v17, %v148_v16  ;;  %v1669_v2 = vsub.f32 %v77_v30, %v156_v41  ;;  %v1671_v3 = vsub.f32 %v79_v31, %v160_v44  ;;  %1261 = vmatpush1.bf16.msra.mxu0 %v1644_v4  ;;  %v1684_v13 = vsub.f32 %v82_v32, %v162_v45  ;;  %v92_v32 = vld [vmem:[%s2153_s1 + $0x138] sm:$0xff]  ;;  %v89_v60 = vld [vmem:[%s2153_s1 + $0x120] sm:$0xff] }
  0x16   :  { %2201 = vst [vmem:[#allocation18_spill] sm:$0xff] %v1665_v58  ;;  %1141 = vmatpush1.bf16.msra.mxu1 %v1644_v4  ;;  %v1686_v14 = vsub.f32 %v84_v36, %v166_v54  ;;  %v168_v16 = vand.u32 4294901760, %v83_v50  ;;  %v1688_v17 = vsub.f32 %v81_v37, %v164_v55  ;;  %1263 = vmatprep.subr.bf16.mxu0 %v1646_v8  ;;  %v170_v30 = vand.u32 4294901760, %v86_v56  ;;  %v93_v46 = vld [vmem:[%s2153_s1 + $0x140] sm:$0x3f] }
  0x17   :  { %2202 = vst [vmem:[#allocation19_spill] sm:$0xff] %v1667_v59  ;;  %1143 = vmatprep.subr.bf16.mxu1 %v1646_v8  ;;  %v1692_v18 = vpack.c.bf16 %v158_v39, %v154_v38  ;;  %v1694_v22 = vpack.c.bf16 %v160_v44, %v156_v41  ;;  %v174_v31 = vand.u32 4294901760, %v88_v57  ;;  %v172_v36 = vand.u32 4294901760, %v85_v7  ;;  %v91_v38 = vld [vmem:[%s2153_s1 + $0x130] sm:$0xff] }
  0x18   :  { %v1699_v4 = vsub.f32 %v83_v50, %v168_v16  ;;  %v176_v11 = vand.u32 4294901760, %v87_v10  ;;  %v178_v37 = vand.u32 4294901760, %v90_v12  ;;  %v1707_v39 = vpack.c.bf16 %v166_v54, %v162_v45  ;;  %v94_v50 = vld [vmem:[%s2153_s1 + $0x148] sm:$0x3f]  ;;  %s1419_s1 = smov [#allocation2]  }
  0x19   :  { %2203 = vst [vmem:[#allocation20_spill] sm:$0xff] %v1692_v18  ;;  %2204 = vst [vmem:[#allocation21_spill] sm:$0xff] %v1694_v22  ;;  %v1709_v41 = vpack.c.bf16 %v168_v16, %v164_v55  ;;  %v1711_v44 = vsub.f32 %v86_v56, %v170_v30  ;;  %v1713_v8 = vsub.f32 %v88_v57, %v174_v31  ;;  %1265 = vmatpush1.bf16.msra.mxu0 %v1650_v40  ;;  %vm99_vm0 = vcmask 1045504   ;;  %s1113_s8 = sshll.u32 %s1419_s1, 4  ;;  %s1114_s8 = int_to_ptr.vmem [resolvable:$true] %s1113_s8 }
  0x1a   :  { %2205 = vst [vmem:[#allocation22_spill] sm:$0xff] %v1707_v39  ;;  %1145 = vmatpush1.bf16.msra.mxu1 %v1650_v40  ;;  %v1723_v45 = vsub.f32 %v85_v7, %v172_v36  ;;  %v1725_v54 = vsub.f32 %v87_v10, %v176_v11  ;;  %v182_v55 = vand.u32 4294901760, %v92_v32  ;;  %v1727_v56 = vsub.f32 %v90_v12, %v178_v37  ;;  %s1389_s9 = scalar_lea.vmem %s1114_s8, 256  ;;  %p1394_p1 = scmp.lt.s32.totalorder %s1114_s8, %s1114_s8 }
  0x1b   :  { %2206 = vst [vmem:[#allocation23_spill] sm:$0xff] %v1709_v41  ;;  %1267 = vmatprep.subr.bf16.mxu0 %v1665_v58  ;;  %1147 = vmatprep.subr.bf16.mxu1 %v1665_v58  ;;  %v1731_v57 = vpack.c.bf16 %v174_v31, %v170_v30  ;;  %v180_v16 = vand.u32 4294901760, %v89_v60  ;;  %v184_v42 = vand.u32 4294901760, %v91_v38  ;;  %v1733_v26 = vpack.c.bf16 %v176_v11, %v172_v36  ;;  %p1390_p0 = scmp.ne.s32.totalorder %s1114_s8, %s1389_s9  ;;  %p1395_p2 = scmp.lt.s32.totalorder %s1389_s9, %s1389_s9 }
  0x1c   :  { %v1735_v20 = vsub.f32 %v92_v32, %v182_v55  ;;  %v1737_v7 = vsel %vm99_vm0, %v94_v50, 0  ;;  %v1739_v10 = vsel %vm99_vm0, %v93_v46, 0  ;;  %v1741_v40 = vpack.c.bf16 %v182_v55, %v178_v37 }
  0x1d   :  { %2207 = vst [vmem:[#allocation24_spill] sm:$0xff] %v1731_v57  ;;  %2208 = vst [vmem:[#allocation25_spill] sm:$0xff] %v1733_v26  ;;  %v1743_v12 = vpack.c.bf16 %v184_v42, %v180_v16  ;;  %v1745_v19 = vsub.f32 %v89_v60, %v180_v16  ;;  %v1747_v58 = vsub.f32 %v91_v38, %v184_v42  ;;  %1269 = vmatpush1.bf16.msra.mxu0 %v1667_v59  ;;  %p1396_p3 = por %p1395_p2, %p1394_p1 }
  0x1e   :  { %2209 = vst [vmem:[#allocation26_spill] sm:$0xff] %v1737_v7  ;;  %2210 = vst [vmem:[#allocation27_spill] sm:$0xff] %v1739_v10  ;;  %1149 = vmatpush1.bf16.msra.mxu1 %v1667_v59  ;;  %v1752_v11 = vand.u32 4294901760, %v1737_v7  ;;  %v231_v30 = vand.u32 4294901760, %v1609_v23  ;;  %v243_v46 = vand.u32 4294901760, %v1628_v1  ;;  %v237_v31 = vand.u32 4294901760, %v1486_v21  ;;  %1271 = vmatprep.subr.bf16.mxu0 %v1692_v18 }
  0x1f   :  { %2211 = vst [vmem:[#allocation28_spill] sm:$0xff] %v1741_v40  ;;  %2212 = vst [vmem:[#allocation29_spill] sm:$0xff] %v1743_v12  ;;  %1151 = vmatprep.subr.bf16.mxu1 %v1692_v18  ;;  %v1760_v42 = vand.u32 4294901760, %v1739_v10  ;;  %v249_v60 = vand.u32 4294901760, %v1494_v25  ;;  %v255_v32 = vand.u32 4294901760, %v1498_v27  ;;  %v267_v36 = vand.u32 4294901760, %v1500_v28  ;;  %p1397_p4 = pnand %p1396_p3, %p1390_p0 }
  0x20   :  { %2213 = vst [vmem:[#allocation30_spill] sm:$0xff] %v1747_v58  ;;  %2214 = vst [vmem:[#allocation31_spill] sm:$0xff] %v1752_v11  ;;  %v1765_v37 = vpack.c.bf16 %v243_v46, %v231_v30  ;;  %v232_v38 = vsub.f32 %v1609_v23, %v231_v30  ;;  %v244_v50 = vsub.f32 %v1628_v1, %v243_v46  ;;  %v261_v55 = vand.u32 4294901760, %v1508_v34 }
  0x21   :  { %2215 = vst [vmem:[#allocation32_spill] sm:$0xff] %v1760_v42  ;;  %v1770_v16 = vpack.c.bf16 %v249_v60, %v237_v31  ;;  %v1772_v18 = vpack.c.bf16 %v267_v36, %v255_v32  ;;  %v238_v59 = vsub.f32 %v1486_v21, %v237_v31  ;;  %v250_v10 = vsub.f32 %v1494_v25, %v249_v60 }
  0x22   :  { %1273 = vmatpush1.bf16.msra.mxu0 %v1694_v22  ;;  %1153 = vmatpush1.bf16.msra.mxu1 %v1694_v22  ;;  %v233_v7 = vand.u32 4294901760, %v232_v38  ;;  %v245_v58 = vand.u32 4294901760, %v244_v50  ;;  %v273_v30 = vand.u32 4294901760, %v1531_v43  ;;  %v256_v46 = vsub.f32 %v1498_v27, %v255_v32 }
  0x23   :  { %2216 = vst [vmem:[#allocation33_spill] sm:$0xff] %v1770_v16  ;;  %2217 = vst [vmem:[#allocation34_spill] sm:$0xff] %v1772_v18  ;;  %1275 = vmatprep.subr.bf16.mxu0 %v1707_v39  ;;  %1155 = vmatprep.subr.bf16.mxu1 %v1707_v39  ;;  %v239_v16 = vand.u32 4294901760, %v238_v59  ;;  %v251_v18 = vand.u32 4294901760, %v250_v10  ;;  %v268_v31 = vsub.f32 %v1500_v28, %v267_v36  ;;  %v279_v60 = vand.u32 4294901760, %v1537_v47 }
  0x24   :  { %v1784_v25 = vpack.c.bf16 %v245_v58, %v233_v7  ;;  %v1786_v21 = vpack.c.bf16 %v273_v30, %v261_v55  ;;  %v257_v38 = vand.u32 4294901760, %v256_v46  ;;  %v291_v50 = vand.u32 4294901760, %v1539_v48 }
  0x25   :  { %v1789_v22 = vpack.c.bf16 %v251_v18, %v239_v16  ;;  %v269_v32 = vand.u32 4294901760, %v268_v31  ;;  %v262_v27 = vsub.f32 %v1508_v34, %v261_v55  ;;  %v274_v39 = vsub.f32 %v1531_v43, %v273_v30 }
  0x26   :  { %2218 = vst [vmem:[#allocation35_spill] sm:$0xff] %v1786_v21  ;;  %1277 = vmatpush1.bf16.msra.mxu0 %v1709_v41  ;;  %1157 = vmatpush1.bf16.msra.mxu1 %v1709_v41  ;;  %v1795_v59 = vpack.c.bf16 %v291_v50, %v279_v60  ;;  %v285_v58 = vand.u32 4294901760, %v1550_v52  ;;  %v297_v7 = vand.u32 4294901760, %v1552_v53  ;;  %v280_v10 = vsub.f32 %v1537_v47, %v279_v60 }
  0x27   :  { %1279 = vmatprep.subr.bf16.mxu0 %v1731_v57  ;;  %1159 = vmatprep.subr.bf16.mxu1 %v1731_v57  ;;  %v1802_v18 = vpack.c.bf16 %v269_v32, %v257_v38  ;;  %v263_v36 = vand.u32 4294901760, %v262_v27  ;;  %v275_v55 = vand.u32 4294901760, %v274_v39  ;;  %v292_v16 = vsub.f32 %v1539_v48, %v291_v50 }
  0x28   :  { %2219 = vst [vmem:[#allocation36_spill] sm:$0xff] %v1795_v59  ;;  %v1805_v30 = vpack.c.bf16 %v297_v7, %v285_v58  ;;  %v281_v46 = vand.u32 4294901760, %v280_v10  ;;  %v303_v31 = vand.u32 4294901760, %v1569_v61  ;;  %v315_v41 = vand.u32 4294901760, %v1571_v62 }
  0x29   :  { %v1809_v59 = vpack.c.bf16 %v275_v55, %v263_v36  ;;  %v293_v60 = vand.u32 4294901760, %v292_v16  ;;  %v286_v21 = vsub.f32 %v1550_v52, %v285_v58  ;;  %v298_v57 = vsub.f32 %v1552_v53, %v297_v7 }
  0x2a   :  { %2220 = vst [vmem:[#allocation37_spill] sm:$0xff] %v1805_v30  ;;  %1281 = vmatpush1.bf16.msra.mxu0 %v1733_v26  ;;  %1161 = vmatpush1.bf16.msra.mxu1 %v1733_v26  ;;  %v1815_v27 = vpack.c.bf16 %v315_v41, %v303_v31  ;;  %v309_v39 = vand.u32 4294901760, %v1574_v63  ;;  %v321_v38 = vand.u32 4294901760, %v1584_v6  ;;  %v304_v50 = vsub.f32 %v1569_v61, %v303_v31 }
  0x2b   :  { %1283 = vmatprep.subr.bf16.mxu0 %v1741_v40  ;;  %1163 = vmatprep.subr.bf16.mxu1 %v1741_v40  ;;  %v1822_v32 = vpack.c.bf16 %v293_v60, %v281_v46  ;;  %v287_v58 = vand.u32 4294901760, %v286_v21  ;;  %v299_v7 = vand.u32 4294901760, %v298_v57  ;;  %v316_v10 = vsub.f32 %v1571_v62, %v315_v41 }
  0x2c   :  { %2221 = vst [vmem:[#allocation38_spill] sm:$0xff] %v1815_v27  ;;  %v1825_v36 = vpack.c.bf16 %v321_v38, %v309_v39  ;;  %v305_v55 = vand.u32 4294901760, %v304_v50  ;;  %v327_v16 = vand.u32 4294901760, %v1587_v9  ;;  %v339_v26 = vand.u32 4294901760, %v1596_v0 }
  0x2d   :  { %v1829_v27 = vpack.c.bf16 %v299_v7, %v287_v58  ;;  %v317_v31 = vand.u32 4294901760, %v316_v10  ;;  %v310_v30 = vsub.f32 %v1574_v63, %v309_v39  ;;  %v322_v40 = vsub.f32 %v1584_v6, %v321_v38 }
  0x2e   :  { %2222 = vst [vmem:[#allocation39_spill] sm:$0xff] %v1825_v36  ;;  %1285 = vmatpush1.bf16.msra.mxu0 %v1743_v12  ;;  %1165 = vmatpush1.bf16.msra.mxu1 %v1743_v12  ;;  %v1835_v21 = vpack.c.bf16 %v339_v26, %v327_v16  ;;  %v333_v41 = vand.u32 4294901760, %v1598_v15  ;;  %v345_v57 = vand.u32 4294901760, %v1611_v24  ;;  %v328_v46 = vsub.f32 %v1587_v9, %v327_v16 }
  0x2f   :  { %752 = vmatprep.subr.mxu0 %v1752_v11  ;;  %187 = vmatprep.subr.mxu1 %v1752_v11  ;;  %v1842_v60 = vpack.c.bf16 %v317_v31, %v305_v55  ;;  %v311_v39 = vand.u32 4294901760, %v310_v30  ;;  %v323_v38 = vand.u32 4294901760, %v322_v40  ;;  %v340_v50 = vsub.f32 %v1596_v0, %v339_v26 }
  0x30   :  { %2223 = vst [vmem:[#allocation40_spill] sm:$0xff] %v1835_v21  ;;  %v1845_v58 = vpack.c.bf16 %v345_v57, %v333_v41  ;;  %v329_v7 = vand.u32 4294901760, %v328_v46  ;;  %v351_v10 = vand.u32 4294901760, %v1614_v29  ;;  %v363_v12 = vand.u32 4294901760, %v1630_v5 }
  0x31   :  { %v1849_v21 = vpack.c.bf16 %v323_v38, %v311_v39  ;;  %v341_v16 = vand.u32 4294901760, %v340_v50  ;;  %v334_v36 = vsub.f32 %v1598_v15, %v333_v41  ;;  %v346_v11 = vsub.f32 %v1611_v24, %v345_v57 }
  0x32   :  { %2224 = vst [vmem:[#allocation41_spill] sm:$0xff] %v1845_v58  ;;  %754 = vmatpush1.msra.mxu0 %v1760_v42  ;;  %189 = vmatpush1.msra.mxu1 %v1760_v42  ;;  %v1855_v40 = vpack.c.bf16 %v363_v12, %v351_v10  ;;  %v357_v26 = vand.u32 4294901760, %v1632_v33  ;;  %v369_v30 = vand.u32 4294901760, %v1634_v35  ;;  %v352_v55 = vsub.f32 %v1614_v29, %v351_v10 }
  0x33   :  { %1287 = vmatprep.subr.bf16.mxu0 %v1765_v37  ;;  %1167 = vmatprep.subr.bf16.mxu1 %v1784_v25  ;;  %v1862_v31 = vpack.c.bf16 %v341_v16, %v329_v7  ;;  %v335_v41 = vand.u32 4294901760, %v334_v36  ;;  %v347_v57 = vand.u32 4294901760, %v346_v11  ;;  %v364_v46 = vsub.f32 %v1630_v5, %v363_v12 }
  0x34   :  { %2225 = vst [vmem:[#allocation42_spill] sm:$0xff] %v1855_v40  ;;  %v1865_v39 = vpack.c.bf16 %v369_v30, %v357_v26  ;;  %v353_v38 = vand.u32 4294901760, %v352_v55  ;;  %v375_v50 = vand.u32 4294901760, %v1655_v51  ;;  %v387_v42 = vand.u32 4294901760, %v1657_v49 }
  0x35   :  { %2226 = vst [vmem:[#allocation43_spill] sm:$0xff] %v1862_v31  ;;  %v1869_v40 = vpack.c.bf16 %v347_v57, %v335_v41  ;;  %v365_v10 = vand.u32 4294901760, %v364_v46  ;;  %v358_v37 = vsub.f32 %v1632_v33, %v357_v26  ;;  %v370_v25 = vsub.f32 %v1634_v35, %v369_v30 }
  0x36   :  { %2227 = vst [vmem:[#allocation44_spill] sm:$0xff] %v1865_v39  ;;  %v1873_v7 = vpack.c.bf16 %v387_v42, %v375_v50  ;;  %v381_v11 = vand.u32 4294901760, %v1669_v2  ;;  %v393_v12 = vand.u32 4294901760, %v1671_v3  ;;  %v376_v36 = vsub.f32 %v1655_v51, %v375_v50 }
  0x37   :  { %2228 = vst [vmem:[#allocation45_spill] sm:$0xff] %v1869_v40  ;;  %v1878_v16 = vpack.c.bf16 %v365_v10, %v353_v38  ;;  %v359_v55 = vand.u32 4294901760, %v358_v37  ;;  %v371_v39 = vand.u32 4294901760, %v370_v25  ;;  %v388_v41 = vsub.f32 %v1657_v49, %v387_v42 }
  0x38   :  { %2229 = vst [vmem:[#allocation46_spill] sm:$0xff] %v1873_v7  ;;  %v1881_v57 = vpack.c.bf16 %v393_v12, %v381_v11  ;;  %v377_v46 = vand.u32 4294901760, %v376_v36  ;;  %v399_v26 = vand.u32 4294901760, %v1684_v13  ;;  %v411_v30 = vand.u32 4294901760, %v1686_v14 }
  0x39   :  { %2230 = vst [vmem:[#allocation47_spill] sm:$0xff] %v1878_v16  ;;  %v1885_v7 = vpack.c.bf16 %v371_v39, %v359_v55  ;;  %v389_v40 = vand.u32 4294901760, %v388_v41  ;;  %v382_v31 = vsub.f32 %v1669_v2, %v381_v11  ;;  %v394_v50 = vsub.f32 %v1671_v3, %v393_v12 }
  0x3a   :  { %2231 = vst [vmem:[#allocation48_spill] sm:$0xff] %v1881_v57  ;;  %v1889_v38 = vpack.c.bf16 %v411_v30, %v399_v26  ;;  %v405_v10 = vand.u32 4294901760, %v1688_v17  ;;  %v417_v42 = vand.u32 4294901760, %v1699_v4  ;;  %v400_v37 = vsub.f32 %v1684_v13, %v399_v26 }
  0x3b   :  { %2232 = vst [vmem:[#allocation49_spill] sm:$0xff] %v1885_v7  ;;  %v1894_v25 = vpack.c.bf16 %v389_v40, %v377_v46  ;;  %v383_v36 = vand.u32 4294901760, %v382_v31  ;;  %v395_v57 = vand.u32 4294901760, %v394_v50  ;;  %v412_v39 = vsub.f32 %v1686_v14, %v411_v30 }
  0x3c   :  { %2233 = vst [vmem:[#allocation50_spill] sm:$0xff] %v1889_v38  ;;  %v1897_v55 = vpack.c.bf16 %v417_v42, %v405_v10  ;;  %v401_v41 = vand.u32 4294901760, %v400_v37  ;;  %v423_v11 = vand.u32 4294901760, %v1711_v44  ;;  %v435_v12 = vand.u32 4294901760, %v1713_v8 }
  0x3d   :  { %2234 = vst [vmem:[#allocation51_spill] sm:$0xff] %v1894_v25  ;;  %v1901_v38 = vpack.c.bf16 %v395_v57, %v383_v36  ;;  %v413_v7 = vand.u32 4294901760, %v412_v39  ;;  %v406_v16 = vsub.f32 %v1688_v17, %v405_v10  ;;  %v418_v26 = vsub.f32 %v1699_v4, %v417_v42 }
  0x3e   :  { %2235 = vst [vmem:[#allocation52_spill] sm:$0xff] %v1897_v55  ;;  %v1905_v40 = vpack.c.bf16 %v435_v12, %v423_v11  ;;  %v429_v31 = vand.u32 4294901760, %v1723_v45  ;;  %v441_v46 = vand.u32 4294901760, %v1725_v54  ;;  %v424_v30 = vsub.f32 %v1711_v44, %v423_v11 }
  0x3f   :  { %2236 = vst [vmem:[#allocation53_spill] sm:$0xff] %v1901_v38  ;;  %v1910_v50 = vpack.c.bf16 %v413_v7, %v401_v41  ;;  %v407_v37 = vand.u32 4294901760, %v406_v16  ;;  %v419_v55 = vand.u32 4294901760, %v418_v26  ;;  %v436_v57 = vsub.f32 %v1713_v8, %v435_v12  ;;  %v2242_v41 = vld [vmem:[#allocation30_spill] sm:$0xff] }
  0x40   :  { %2237 = vst [vmem:[#allocation54_spill] sm:$0xff] %v1905_v40  ;;  %v1913_v36 = vpack.c.bf16 %v441_v46, %v429_v31  ;;  %v425_v39 = vand.u32 4294901760, %v424_v30  ;;  %v447_v10 = vand.u32 4294901760, %v1727_v56  ;;  %v459_v42 = vand.u32 4294901760, %v1735_v20 }
  0x41   :  { %2238 = vst [vmem:[#allocation55_spill] sm:$0xff] %v1910_v50  ;;  %v1917_v40 = vpack.c.bf16 %v419_v55, %v407_v37  ;;  %v437_v38 = vand.u32 4294901760, %v436_v57  ;;  %v430_v25 = vsub.f32 %v1723_v45, %v429_v31  ;;  %v442_v11 = vsub.f32 %v1725_v54, %v441_v46 }
  0x42   :  { %2239 = vst [vmem:[#allocation56_spill] sm:$0xff] %v1913_v36  ;;  %v1921_v7 = vpack.c.bf16 %v459_v42, %v447_v10  ;;  %v453_v16 = vand.u32 4294901760, %v1745_v19  ;;  %v465_v12 = vand.u32 4294901760, %v2242_v41  ;;  %v448_v26 = vsub.f32 %v1727_v56, %v447_v10 }
  0x43   :  { %2240 = vst [vmem:[#allocation57_spill] sm:$0xff] %v1917_v40  ;;  %v1926_v30 = vpack.c.bf16 %v437_v38, %v425_v39  ;;  %v431_v36 = vand.u32 4294901760, %v430_v25  ;;  %v443_v50 = vand.u32 4294901760, %v442_v11  ;;  %v460_v55 = vsub.f32 %v1735_v20, %v459_v42  ;;  %v2245_v38 = vld [vmem:[#allocation7_spill] sm:$0xff]  ;;  %v2246_v39 = vld [vmem:[#allocation8_spill] sm:$0xff] }
  0x44   :  { %2241 = vst [vmem:[#allocation58_spill] sm:$0xff] %v1921_v7  ;;  %v1929_v37 = vpack.c.bf16 %v465_v12, %v453_v16  ;;  %v449_v57 = vand.u32 4294901760, %v448_v26  ;;  %v454_v31 = vsub.f32 %v1745_v19, %v453_v16  ;;  %v466_v40 = vsub.f32 %v2242_v41, %v465_v12  ;;  %v2250_v25 = vld [vmem:[#allocation35_spill] sm:$0xff] }
  0x45   :  { %2243 = vst [vmem:[#allocation30_spill] sm:$0xff] %v1926_v30  ;;  %v1932_v46 = vpack.c.bf16 %v443_v50, %v431_v36  ;;  %v461_v7 = vand.u32 4294901760, %v460_v55  ;;  %v1206_v10 = vpack.c.bf16 %v1628_v1, %v1609_v23  ;;  %v2247_v30 = vld [vmem:[#allocation10_spill] sm:$0xff]  ;;  %v13_v12 = vlaneseq  ;;  %v2288_v23 = vld [vmem:[#allocation13_spill] sm:$0xff] }
  0x46   :  { %2244 = vst [vmem:[#allocation59_spill] sm:$0xff] %v1929_v37  ;;  %v455_v58 = vand.u32 4294901760, %v454_v31  ;;  %v467_v42 = vand.u32 4294901760, %v466_v40  ;;  %v2289_v1 = vpack.c.bf16 %v1539_v48, %v1537_v47  ;;  %v2296_v47 = vld [vmem:[#allocation17_spill] sm:$0xff]  ;;  %v2297_v48 = vpack.c.bf16 %v1596_v0, %v1587_v9 }
  0x47   :  { %v1939_v11 = vpack.c.bf16 %v461_v7, %v449_v57  ;;  %v2249_v7 = vld [vmem:[#allocation34_spill] sm:$0xff]  ;;  %v2304_v9 = vld [vmem:[#allocation21_spill] sm:$0xff]  ;;  %v2305_v0 = vpack.c.bf16 %v1657_v49, %v1655_v51  ;;  %v2313_v49 = vpack.c.bf16 %v1713_v8, %v1711_v44 }
  0x48   :  { %v1943_v37 = vpack.c.bf16 %v467_v42, %v455_v58  ;;  %v14_v42 = vand.u32 127, %v13_v12  ;;  %v1418_v12 = vmov 0.0   ;;  %v2312_v51 = vld [vmem:[#allocation25_spill] sm:$0xff] }
  0x4a   :  { %v15_v40 = vadd.s32 128, %v14_v42 }
  0x81   :  { %v30_v16 = vpop.permute.xlu1 %29  ;;  %v18_v36 = vpop.permute.xlu0 %17 }
  0x82   :  { %vm19_vm1 = vcmp.eq.s32.totalorder %v14_v42, %v18_v36  ;;  %vm20_vm4 = vcmp.eq.s32.totalorder %v15_v40, %v18_v36  ;;  %vm31_vm6 = vcmp.eq.s32.totalorder %v14_v42, %v30_v16  ;;  %vm32_vm8 = vcmp.eq.s32.totalorder %v15_v40, %v30_v16 }
  0x86   :  { %v37_v50 = vpop.permute.xlu1 %36  ;;  %v23_v26 = vpop.permute.xlu0 %22 }
  0x87   :  { %vm24_vm2 = vcmp.eq.s32.totalorder %v14_v42, %v23_v26  ;;  %vm25_vm3 = vcmp.eq.s32.totalorder %v15_v40, %v23_v26  ;;  %vm38_vm10 = vcmp.eq.s32.totalorder %v14_v42, %v37_v50  ;;  %vm39_vm12 = vcmp.eq.s32.totalorder %v15_v40, %v37_v50 }
  0x88   :  { %vm26_vm5 = vmor %vm19_vm1, %vm24_vm2  ;;  %vm95_vm2 = vcmask 310272  }
  0x89   :  { %vm27_vm7 = vmor %vm20_vm4, %vm25_vm3  ;;  %vm1105_vm4 = vcmask 261120  }
  0x8a   :  { %vm33_vm9 = vmor %vm26_vm5, %vm31_vm6 }
  0x8b   :  { %vm34_vm11 = vmor %vm27_vm7, %vm32_vm8  ;;  %v44_v57 = vpop.permute.xlu1 %43 }
  0x8c   :  { %vm40_vm13 = vmor %vm33_vm9, %vm38_vm10  ;;  %vm45_vm14 = vcmp.eq.s32.totalorder %v14_v42, %v44_v57  ;;  %vm46_vm15 = vcmp.eq.s32.totalorder %v15_v40, %v44_v57 }
  0x8d   :  { %vm41_vm0 = vmor %vm34_vm11, %vm39_vm12 }
  0x8e   :  { %vm47_vm1 = vmor %vm40_vm13, %vm45_vm14 }
  0x8f   :  { %vm48_vm3 = vmor %vm41_vm0, %vm46_vm15  ;;  %v1979_v31 = vsel %vm47_vm1, 1.0, %v1418_v12 }
  0x90   :  { %v1981_v26 = vsel %vm48_vm3, 1.0, %v1418_v12  ;;  %v1985_v36 = vsub.f32 %v1979_v31, %v1979_v31  ;;  %v2248_v12 = vld [vmem:[#allocation33_spill] sm:$0xff] }
  0x91   :  { %v97_v16 = vsel %vm95_vm2, %v1981_v26, 0 }
  0x92   :  { %v1989_v50 = vsub.f32 %v97_v16, %v97_v16  ;;  %v220_v40 = vand.u32 4294901760, %v1985_v36 }
  0x94   :  { %v214_v57 = vand.u32 4294901760, %v1989_v50  ;;  %v221_v42 = vsub.f32 %v1985_v36, %v220_v40 }
  0x96   :  { %780 = vmatprep.mubr.f32.mxu0 %v214_v57  ;;  %v215_v55 = vsub.f32 %v1989_v50, %v214_v57  ;;  %v222_v16 = vand.u32 4294901760, %v221_v42  ;;  %v2252_v57 = vld [vmem:[#allocation37_spill] sm:$0xff]  ;;  %v2261_v42 = vld [vmem:[#allocation47_spill] sm:$0xff] }
  0x97   :  { %784 = vmatmul.mubr.f32.vlgmr.msra.gmra.mrb[0].mxu0 %v220_v40  ;;  %v2251_v40 = vld [vmem:[#allocation36_spill] sm:$0xff] }
  0x98   :  { %1289 = vmatpush1.bf16.msra.mxu0 %v2248_v12  ;;  %1124 = vmatprep.mubr.msk.f32.mxu0 %vm95_vm2, %v1981_v26  ;;  %v216_v58 = vand.u32 4294901760, %v215_v55  ;;  %v2259_v55 = vld [vmem:[#allocation45_spill] sm:$0xff] }
  0x99   :  { %1291 = vmatprep.subr.bf16.mxu0 %v2249_v7  ;;  %v2253_v7 = vld [vmem:[#allocation38_spill] sm:$0xff]  ;;  %v2263_v12 = vld [vmem:[#allocation49_spill] sm:$0xff] }
  0x9a   :  { %217 = vmatprep.mubr.f32.mxu1 %v216_v58  ;;  %v2257_v58 = vld [vmem:[#allocation43_spill] sm:$0xff] }
  0x9b   :  { %223 = vmatmul.mubr.f32.vlgmr.msra.gmra.mrb[0].mxu1 %v222_v16  ;;  %v2265_v16 = vld [vmem:[#allocation51_spill] sm:$0xff] }
  0x9c   :  { %1169 = vmatpush1.bf16.msra.mxu1 %v1789_v22  ;;  %1293 = vmatpush1.bf16.msra.mxu0 %v2250_v25  ;;  %v2254_v22 = vld [vmem:[#allocation39_spill] sm:$0xff]  ;;  %v2255_v25 = vld [vmem:[#allocation40_spill] sm:$0xff] }
  0x9d   :  { %1123 = vmatprep.mubr.msk.f32.mxu1 %vm95_vm2, %v1981_v26  ;;  %1171 = vmatprep.subr.bf16.mxu1 %v1802_v18  ;;  %v2256_v18 = vld [vmem:[#allocation41_spill] sm:$0xff] }
  0x9e   :  { %1295 = vmatprep.subr.bf16.mxu0 %v2251_v40  ;;  %v2267_v40 = vld [vmem:[#allocation31_spill] sm:$0xff] }
  0xa0   :  { %1173 = vmatpush1.bf16.msra.mxu1 %v1809_v59  ;;  %1297 = vmatpush1.bf16.msra.mxu0 %v2252_v57  ;;  %v2258_v59 = vld [vmem:[#allocation42_spill] sm:$0xff] }
  0xa1   :  { %1175 = vmatprep.subr.bf16.mxu1 %v1822_v32  ;;  %1299 = vmatprep.subr.bf16.mxu0 %v2253_v7  ;;  %v2260_v32 = vld [vmem:[#allocation44_spill] sm:$0xff]  ;;  %v2268_v57 = vld [vmem:[#allocation26_spill] sm:$0xff] }
  0xa2   :  { %v2027_v7 = vsub.f32 %v2268_v57, %v2267_v40 }
  0xa4   :  { %1177 = vmatpush1.bf16.msra.mxu1 %v1829_v27  ;;  %1301 = vmatpush1.bf16.msra.mxu0 %v2254_v22  ;;  %v2262_v27 = vld [vmem:[#allocation46_spill] sm:$0xff]  ;;  %v2269_v22 = vld [vmem:[#allocation32_spill] sm:$0xff] }
  0xa5   :  { %1179 = vmatprep.subr.bf16.mxu1 %v1842_v60  ;;  %1303 = vmatprep.subr.bf16.mxu0 %v2255_v25  ;;  %v2264_v60 = vld [vmem:[#allocation48_spill] sm:$0xff]  ;;  %v2270_v25 = vld [vmem:[#allocation27_spill] sm:$0xff] }
  0xa8   :  { %1181 = vmatpush1.bf16.msra.mxu1 %v1849_v21  ;;  %1305 = vmatpush1.bf16.msra.mxu0 %v2256_v18  ;;  %v2266_v21 = vld [vmem:[#allocation50_spill] sm:$0xff]  ;;  %v2031_v18 = vsub.f32 %v2270_v25, %v2269_v22  ;;  %v2279_v25 = vld [vmem:[#allocation59_spill] sm:$0xff] }
  0xa9   :  { %1183 = vmatprep.subr.bf16.mxu1 %v2257_v58  ;;  %1307 = vmatprep.subr.bf16.mxu0 %v2258_v59  ;;  %v2271_v58 = vld [vmem:[#allocation53_spill] sm:$0xff]  ;;  %v2272_v59 = vld [vmem:[#allocation52_spill] sm:$0xff] }
  0xac   :  { %1185 = vmatpush1.bf16.msra.mxu1 %v2259_v55  ;;  %1309 = vmatpush1.bf16.msra.mxu0 %v2260_v32  ;;  %v2273_v55 = vld [vmem:[#allocation55_spill] sm:$0xff]  ;;  %v2274_v32 = vld [vmem:[#allocation54_spill] sm:$0xff] }
  0xad   :  { %1187 = vmatprep.subr.bf16.mxu1 %v2261_v42  ;;  %1311 = vmatprep.subr.bf16.mxu0 %v2262_v27  ;;  %v471_v42 = vand.u32 4294901760, %v2027_v7  ;;  %v2275_v27 = vld [vmem:[#allocation57_spill] sm:$0xff] }
  0xaf   :  { %v472_v57 = vsub.f32 %v2027_v7, %v471_v42 }
  0xb0   :  { %1189 = vmatpush1.bf16.msra.mxu1 %v2263_v12  ;;  %1313 = vmatpush1.bf16.msra.mxu0 %v2264_v60  ;;  %v2276_v12 = vld [vmem:[#allocation56_spill] sm:$0xff]  ;;  %v477_v60 = vand.u32 4294901760, %v2031_v18 }
  0xb1   :  { %1191 = vmatprep.subr.bf16.mxu1 %v2265_v16  ;;  %1315 = vmatprep.subr.bf16.mxu0 %v2266_v21  ;;  %v2277_v16 = vld [vmem:[#allocation30_spill] sm:$0xff] }
  0xb2   :  { %v2278_v21 = vld [vmem:[#allocation58_spill] sm:$0xff] }
  0xb4   :  { %1193 = vmatpush1.bf16.msra.mxu1 %v2271_v58  ;;  %1317 = vmatpush1.bf16.msra.mxu0 %v2272_v59  ;;  %v478_v58 = vsub.f32 %v2031_v18, %v477_v60  ;;  %v473_v59 = vand.u32 4294901760, %v472_v57 }
  0xb5   :  { %1195 = vmatprep.subr.bf16.mxu1 %v2273_v55  ;;  %1319 = vmatprep.subr.bf16.mxu0 %v2274_v32  ;;  %v2280_v32 = vld [vmem:[#allocation5_spill] sm:$0xff] }
  0xb6   :  { %v479_v55 = vand.u32 4294901760, %v478_v58 }
  0xb8   :  { %1197 = vmatpush1.bf16.msra.mxu1 %v2275_v27  ;;  %1321 = vmatpush1.bf16.msra.mxu0 %v2276_v12  ;;  %v2281_v27 = vld [vmem:[#allocation6_spill] sm:$0xff]  ;;  %v2287_v12 = vpack.c.bf16 %v1531_v43, %v1508_v34  ;;  %v2294_v34 = vld [vmem:[#allocation16_spill] sm:$0xff]  ;;  %v2295_v43 = vpack.c.bf16 %v1584_v6, %v1574_v63  ;;  %v2303_v6 = vpack.c.bf16 %v1634_v35, %v1632_v33 }
  0xb9   :  { %1199 = vmatprep.subr.bf16.mxu1 %v2277_v16  ;;  %1323 = vmatprep.subr.bf16.mxu0 %v2278_v21  ;;  %v2302_v63 = vld [vmem:[#allocation20_spill] sm:$0xff]  ;;  %v2311_v35 = vpack.c.bf16 %v1699_v4, %v1688_v17  ;;  %v2318_v4 = vpack.c.bf16 %v2242_v41, %v1745_v19 }
  0xba   :  { %v2310_v33 = vld [vmem:[#allocation24_spill] sm:$0xff] }
  0xbc   :  { %1201 = vmatpush1.bf16.msra.mxu1 %v1932_v46  ;;  %1325 = vmatpush1.bf16.msra.mxu0 %v2279_v25  ;;  %v2282_v46 = vld [vmem:[#allocation9_spill] sm:$0xff] }
  0xbd   :  { %1203 = vmatprep.subr.bf16.mxu1 %v1939_v11  ;;  %953 = vmatprep.subr.mxu0 %v471_v42  ;;  %v2284_v11 = vld [vmem:[#allocation11_spill] sm:$0xff]  ;;  %v2286_v42 = vld [vmem:[#allocation12_spill] sm:$0xff] }
  0xc0   :  { %1205 = vmatpush1.bf16.msra.mxu1 %v1943_v37  ;;  %957 = vmatpush1.msra.mxu0 %v477_v60  ;;  %v2283_v37 = vpack.c.bf16 %v2246_v39, %v2245_v38  ;;  %v2291_v38 = vpack.c.bf16 %v1552_v53, %v1550_v52  ;;  %v2298_v52 = vld [vmem:[#allocation18_spill] sm:$0xff]  ;;  %v2299_v53 = vpack.c.bf16 %v1611_v24, %v1598_v15 }
  0xc1   :  { %983 = vmatmul.mubr.f32.vlgmr.msra.gmra.mrb[0].mxu0 %v1979_v31  ;;  %1327 = vmatprep.subr.bf16.mxu0 %v2280_v32  ;;  %v2306_v15 = vld [vmem:[#allocation22_spill] sm:$0xff]  ;;  %v2307_v24 = vpack.c.bf16 %v1671_v3, %v1669_v2  ;;  %v2314_v2 = vld [vmem:[#allocation28_spill] sm:$0xff]  ;;  %v2315_v3 = vpack.c.bf16 %v1725_v54, %v1723_v45 }
  0xc2   :  { %1329 = vmatpush1.bf16.msra.mxu0 %v2281_v27  ;;  %1125 = vmatprep.mubr.msk.f32.mxu0 %vm95_vm2, %v1981_v26  ;;  %v2285_v26 = vpack.c.bf16 %v1500_v28, %v2247_v30  ;;  %v2292_v28 = vld [vmem:[#allocation15_spill] sm:$0xff]  ;;  %v2293_v30 = vpack.c.bf16 %v1571_v62, %v1569_v61  ;;  %v2301_v62 = vpack.c.bf16 %v1630_v5, %v1614_v29 }
  0xc3   :  { %474 = vmatprep.subr.mxu1 %v473_v59  ;;  %1331 = vmatprep.subr.bf16.mxu0 %v2282_v46  ;;  %v2300_v61 = vld [vmem:[#allocation19_spill] sm:$0xff]  ;;  %v2309_v5 = vpack.c.bf16 %v1686_v14, %v1684_v13  ;;  %v2316_v13 = vld [vmem:[#allocation29_spill] sm:$0xff]  ;;  %v2317_v14 = vpack.c.bf16 %v1735_v20, %v1727_v56 }
  0xc4   :  { %480 = vmatpush1.msra.mxu1 %v479_v55  ;;  %v2308_v29 = vld [vmem:[#allocation23_spill] sm:$0xff] }
  0xc5   :  { %506 = vmatmul.mubr.f32.vlgmr.msra.gmra.mrb[0].mxu1 %v1979_v31  ;;  %1207 = vmatprep.subr.bf16.mxu1 %v1206_v10  ;;  %v2290_v10 = vld [vmem:[#allocation14_spill] sm:$0xff] }
  0xc6   :  { %1209 = vmatpush1.bf16.msra.mxu1 %v2283_v37  ;;  %662 = vmatprep.mubr.f32.mxu1 %v1989_v50 }
  0xc7   :  { %1333 = vmatpush1.bf16.msra.mxu0 %v2284_v11  ;;  %1211 = vmatprep.subr.bf16.mxu1 %v2285_v26 }
  0xc8   :  { %1335 = vmatprep.subr.bf16.mxu0 %v2286_v42 }
  0xca   :  { %1213 = vmatpush1.bf16.msra.mxu1 %v2287_v12 }
  0xcb   :  { %1337 = vmatpush1.bf16.msra.mxu0 %v2288_v23  ;;  %1215 = vmatprep.subr.bf16.mxu1 %v2289_v1 }
  0xcc   :  { %1339 = vmatprep.subr.bf16.mxu0 %v2290_v10 }
  0xce   :  { %1217 = vmatpush1.bf16.msra.mxu1 %v2291_v38 }
  0xcf   :  { %1341 = vmatpush1.bf16.msra.mxu0 %v2292_v28  ;;  %1219 = vmatprep.subr.bf16.mxu1 %v2293_v30 }
  0xd0   :  { %1343 = vmatprep.subr.bf16.mxu0 %v2294_v34 }
  0xd2   :  { %1221 = vmatpush1.bf16.msra.mxu1 %v2295_v43 }
  0xd3   :  { %1345 = vmatpush1.bf16.msra.mxu0 %v2296_v47  ;;  %1223 = vmatprep.subr.bf16.mxu1 %v2297_v48 }
  0xd4   :  { %1347 = vmatprep.subr.bf16.mxu0 %v2298_v52 }
  0xd6   :  { %1225 = vmatpush1.bf16.msra.mxu1 %v2299_v53 }
  0xd7   :  { %1349 = vmatpush1.bf16.msra.mxu0 %v2300_v61  ;;  %1227 = vmatprep.subr.bf16.mxu1 %v2301_v62 }
  0xd8   :  { %1351 = vmatprep.subr.bf16.mxu0 %v2302_v63 }
  0xda   :  { %1229 = vmatpush1.bf16.msra.mxu1 %v2303_v6 }
  0xdb   :  { %1353 = vmatpush1.bf16.msra.mxu0 %v2304_v9  ;;  %1231 = vmatprep.subr.bf16.mxu1 %v2305_v0 }
  0xdc   :  { %1355 = vmatprep.subr.bf16.mxu0 %v2306_v15 }
  0xde   :  { %1233 = vmatpush1.bf16.msra.mxu1 %v2307_v24 }
  0xdf   :  { %1357 = vmatpush1.bf16.msra.mxu0 %v2308_v29  ;;  %1235 = vmatprep.subr.bf16.mxu1 %v2309_v5 }
  0xe0   :  { %1359 = vmatprep.subr.bf16.mxu0 %v2310_v33 }
  0xe2   :  { %1237 = vmatpush1.bf16.msra.mxu1 %v2311_v35 }
  0xe3   :  { %1361 = vmatpush1.bf16.msra.mxu0 %v2312_v51  ;;  %1239 = vmatprep.subr.bf16.mxu1 %v2313_v49 }
  0xe4   :  { %1363 = vmatprep.subr.bf16.mxu0 %v2314_v2 }
  0xe6   :  { %1241 = vmatpush1.bf16.msra.mxu1 %v2315_v3 }
  0xe7   :  { %1365 = vmatpush1.bf16.msra.mxu0 %v2316_v13  ;;  %1243 = vmatprep.subr.bf16.mxu1 %v2317_v14 }
  0xe8   :  { %1070 = vmatprep.subr.mxu0 %v2267_v40 }
  0xea   :  { %1245 = vmatpush1.bf16.msra.mxu1 %v2318_v4 }
  0xeb   :  { %1072 = vmatpush1.msra.mxu0 %v2269_v22  ;;  %634 = vmatprep.subr.mxu1 %v2027_v7 }
  0xec   :  { %1098 = vmatmul.mubr.f32.vlgmr.msra.gmra.mrb[0].mxu0 %v1979_v31 }
  0xee   :  { %637 = vmatpush1.msra.mxu1 %v2031_v18 }
  0xef   :  { %665 = vmatmul.mubr.f32.vlgmr.msra.gmra.mrb[0].mxu1 %v1985_v36 }
 0x1bf   :  { %v1099_v8 = vpop.f32.mrb[0].mxu0 }
 0x1c0   :  { %v1101_v17 = vpop.f32.mrb[1].mxu0 }
 0x1c2   :  { %v666_v20 = vpop.f32.mrb[0].mxu1 }
 0x1c3   :  { %v1366_v44 = vadd.f32 %v1099_v8, %v666_v20  ;;  %v668_v45 = vpop.f32.mrb[1].mxu1 }
 0x1c4   :  { %v1367_v19 = vadd.f32 %v1101_v17, %v668_v45 }
 0x1c5   :  { %1104 = vst [vmem:[#allocation2] sm:$0xff] %v1366_v44 }
 0x1c6   :  { %1106 = vst.msk [vmem:[#allocation2 + $0x8] sm:$0xff] %vm1105_vm4, %v1367_v19 }
 0x1c7   :  { %1400 = shalt.err (!%p1397_p4)
}
 0x1c8   :  { %s1401_s12 = scalar_lea.hbm %s2154_s2, 256 }
 0x1c9   :  { %p1402_p5 = scmp.ne.s32.totalorder %s2154_s2, %s1401_s12  ;;  %p1405_p6 = scmp.lt.u32.totalorder %s1401_s12, %s2154_s2 }
 0x1cb   :  { %p1407_p7 = pnand %p1405_p6, %p1402_p5 }
 0x1cd   :  { %1410 = shalt.err (!%p1407_p7)
}
 0x1ce   :  { %1116 = dma.vmem_to_hbm [thread:$0]  %s1114_s8, 256, %s2154_s2, [#allocation3]  }
 0x1cf   :  { %1411 = dma.done.wait [#allocation3], 256  }
 0x1d0   :  { %1412 = vsyncadd [#allocation3], 4294967040 }
 0x1d1   :  { %1120 = vsyncpa [#allocation3], 1 }

</bundles_post_ra>
